<compile_context>
chip_gen: v6e
topology: v6e:2x2x1
jax: 0.10.0
libtpu: 0.0.40
codegen_flags: <defaults>
</compile_context>

<pallas_src>
import jax
import jax.numpy as jnp
from jax import lax
from jax.experimental import pallas as pl
from jax.experimental.pallas import tpu as pltpu


def cbow_linear_kernel(avg_ref, w_ref, b_ref, out_ref):
    # avg_ref : (B, E)  bf16, averaged context embeddings (resident across grid)
    # w_ref   : (TN, E) bf16, nn.Linear weight tile in PyTorch (out, in) layout
    # b_ref   : (1, TN) f32,  nn.Linear bias tile
    # out_ref : (B, TN) f32,  logits tile
    out_ref[...] = (
        lax.dot_general(
            avg_ref[...],
            w_ref[...],
            dimension_numbers=(((1,), (1,)), ((), ())),   # contract over E
            preferred_element_type=jnp.float32,           # f32 MXU accumulation
        )
        + b_ref[...]
    )


def _pick_vocab_tile(V, cap=2048):
    """Largest multiple of 128 that divides V, capped at `cap`."""
    assert V % 128 == 0, "vocab_size must be a multiple of 128"
    for cand in range(min(cap, V), 127, -128):
        if V % cand == 0:
            return cand
    return 128


def cbow_forward(context_words, emb_table, linear_w, linear_b, *, tn=None):
    """context_words: (B, C) int ; emb_table: (V, E) ; linear_w: (V, E) ; linear_b: (V,)."""
    B, C = context_words.shape
    V, E = emb_table.shape
    assert linear_w.shape == (V, E) and linear_b.shape == (V,)

    if tn is None:
        tn = _pick_vocab_tile(V)
    assert tn % 128 == 0 and V % tn == 0

    # ---- Embedding lookup + mean over the context window (JAX prologue). ----
    # Hoisted out of the grid per the perf review: this is O(B*C*E) work and
    # would otherwise be redone for every vocab tile with the full (V,E) table
    # pinned in VMEM.  Mean is computed in f32, then cast once to bf16 so the
    # MXU operand dtypes match the bf16 weight stream.
    avg = jnp.mean(emb_table.astype(jnp.float32)[context_words], axis=1)   # (B, E) f32
    avg_bf16 = avg.astype(jnp.bfloat16)

    # Cast the weight to bf16 in HBM (halves the streamed bytes; the kernel is
    # HBM-bandwidth bound on this stream at real vocab sizes).
    w_bf16 = linear_w.astype(jnp.bfloat16)
    bias = linear_b.reshape(1, V).astype(jnp.float32)

    grid_spec = pltpu.PrefetchScalarGridSpec(
        num_scalar_prefetch=0,
        grid=(V // tn,),
        in_specs=[
            pl.BlockSpec((B, E), lambda j: (0, 0)),     # avg embeds, resident
            pl.BlockSpec((tn, E), lambda j: (j, 0)),    # weight tile (PyTorch layout)
            pl.BlockSpec((1, tn), lambda j: (0, j)),    # bias tile
        ],
        out_specs=pl.BlockSpec((B, tn), lambda j: (0, j)),
    )

    return pl.pallas_call(
        cbow_linear_kernel,
        out_shape=jax.ShapeDtypeStruct((B, V), jnp.float32),
        grid_spec=grid_spec,
        compiler_params=pltpu.CompilerParams(
            # Vocab tiles are independent -> shard across TensorCores on v7x
            # (inert but harmless on v5e/v6e).
            dimension_semantics=("parallel",),
            # Explicit scoped-VMEM limit (v5e default is 16 MiB); working set
            # here is 2*(TN*E*2) + 2*(B*TN*4) + small, far below this.
            vmem_limit_bytes=32 * 1024 * 1024,
        ),
    )(avg_bf16, w_bf16, bias)


if __name__ == "__main__":
    # Small, deterministic example consistent with the module:
    # vocab_size = 128, embed_dim = 32, batch = 8, context window = 4.
    V, E, B, C = 128, 32, 8, 4

    key = jax.random.PRNGKey(0)
    k_emb, k_w, k_b, k_idx = jax.random.split(key, 4)

    emb_table = jax.random.normal(k_emb, (V, E), dtype=jnp.float32)        # nn.Embedding weight
    linear_w = jax.random.normal(k_w, (V, E), dtype=jnp.float32) * 0.1     # nn.Linear weight (out, in)
    linear_b = jax.random.normal(k_b, (V,), dtype=jnp.float32) * 0.1       # nn.Linear bias
    context_words = jax.random.randint(k_idx, (B, C), 0, V, dtype=jnp.int32)

    out = cbow_forward(context_words, emb_table, linear_w, linear_b)
    out = jax.block_until_ready(out)
    assert out.shape == (B, V)

    # Reference 1: bf16-consistent (same quantization as the kernel operands,
    # f32 accumulation) -- should match tightly.
    avg_q = jnp.mean(emb_table[context_words], axis=1).astype(jnp.bfloat16).astype(jnp.float32)
    w_q = linear_w.astype(jnp.bfloat16).astype(jnp.float32)
    ref_bf16 = avg_q @ w_q.T + linear_b
    assert jnp.allclose(out, ref_bf16, atol=2e-3, rtol=2e-3), "mismatch vs bf16-consistent reference"

    # Reference 2: pure-f32 PyTorch-equivalent forward -- looser tolerance
    # (bf16 weight/activation stream is an intentional perf choice).
    ref_f32 = jnp.mean(emb_table[context_words], axis=1) @ linear_w.T + linear_b
    assert jnp.allclose(out, ref_f32, atol=2e-2, rtol=2e-2), "mismatch vs f32 reference"

    print("KERNEL_OK")
</pallas_src>

<mosaic_0001>
module attributes {stable_mosaic.version = 11 : i64} {
  func.func @cbow_linear_kernel(%arg0: i32, %arg1: memref<8x32xbf16, #tpu.memory_space<vmem>>, %arg2: memref<128x32xbf16, #tpu.memory_space<vmem>>, %arg3: memref<1x128xf32, #tpu.memory_space<vmem>>, %arg4: memref<8x128xf32, #tpu.memory_space<vmem>>) attributes {dimension_semantics = [#tpu.dimension_semantics<parallel>], iteration_bounds = array<i64: 1>, scalar_prefetch = 0 : i64, scratch_operands = 0 : i64, tpu.core_type = #tpu.core_type<tc>, window_params = [{pipeline_mode = #tpu.pipeline_mode<synchronous>, transform_indices = @transform_0, window_bounds = array<i64: 8, 32>}, {transform_indices = @transform_1, window_bounds = array<i64: 128, 32>}, {transform_indices = @transform_2, window_bounds = array<i64: 1, 128>}, {transform_indices = @transform_3, window_bounds = array<i64: 8, 128>}]} {
    %c0 = arith.constant 0 : index
    %c0_0 = arith.constant 0 : index
    %0 = vector.load %arg1[%c0, %c0_0] : memref<8x32xbf16, #tpu.memory_space<vmem>>, vector<8x32xbf16>
    %c0_1 = arith.constant 0 : index
    %c0_2 = arith.constant 0 : index
    %1 = vector.load %arg2[%c0_1, %c0_2] : memref<128x32xbf16, #tpu.memory_space<vmem>>, vector<128x32xbf16>
    %cst = arith.constant dense<0.000000e+00> : vector<8x128xf32>
    %2 = tpu.matmul %0, %1, %cst {dimension_numbers = #tpu.dot_dimension_numbers<[1], [1], [0], [0], [0, 0, 1, 0], [], []>} : vector<8x32xbf16>, vector<128x32xbf16>, vector<8x128xf32> -> vector<8x128xf32>
    %c0_3 = arith.constant 0 : index
    %c0_4 = arith.constant 0 : index
    %3 = vector.load %arg3[%c0_3, %c0_4] : memref<1x128xf32, #tpu.memory_space<vmem>>, vector<1x128xf32>
    %4 = vector.broadcast %3 : vector<1x128xf32> to vector<8x128xf32>
    %5 = arith.addf %2, %4 : vector<8x128xf32>
    %c0_5 = arith.constant 0 : index
    %c0_6 = arith.constant 0 : index
    %6 = vector.load %arg4[%c0_5, %c0_6] : memref<8x128xf32, #tpu.memory_space<vmem>>, vector<8x128xf32>
    tpu.vector_store %arg4[%c0_5, %c0_6], %5 {strides = array<i32>} : memref<8x128xf32, #tpu.memory_space<vmem>>, vector<8x128xf32>,
    return
  }
  func.func @transform_0(%arg0: i32) -> (i32, i32) {
    %c0_i32 = arith.constant 0 : i32
    %c0_i32_0 = arith.constant 0 : i32
    %c0_i32_1 = arith.constant 0 : i32
    return %c0_i32, %c0_i32_0 : i32, i32
  }
  func.func @transform_1(%arg0: i32) -> (i32, i32) {
    %c0_i32 = arith.constant 0 : i32
    %c0_i32_0 = arith.constant 0 : i32
    return %arg0, %c0_i32 : i32, i32
  }
  func.func @transform_2(%arg0: i32) -> (i32, i32) {
    %c0_i32 = arith.constant 0 : i32
    %c0_i32_0 = arith.constant 0 : i32
    return %c0_i32, %arg0 : i32, i32
  }
  func.func @transform_3(%arg0: i32) -> (i32, i32) {
    %c0_i32 = arith.constant 0 : i32
    %c0_i32_0 = arith.constant 0 : i32
    return %c0_i32, %arg0 : i32, i32
  }
}

</mosaic_0001>

<bundles_post_ra>
// kernel: tpu_custom_call.1
= control target key start
LH: loop header
LB: loop body
LE: loop exit
PB: predicated region body
PF: predicated region fallthrough
CT: control target
= control target key end

     0   :  { %v235_v1 = vmov 0.0   ;;  %vm80_vm0 = vcmask 261120   ;;  %vm236_vm1 = vmmov 0   ;;  %s300_s0 = inlined_call_operand.vmem [shape: bf16[8,32], index: 0, kind: input, shape index: {}]   ;;  %s301_s1 = inlined_call_operand.vmem [shape: bf16[128,32], index: 1, kind: input, shape index: {}]   ;;  %s302_s2 = inlined_call_operand.vmem [shape: f32[1,128], index: 2, kind: input, shape index: {}]   ;;  %s303_s3 = inlined_call_operand.hbm [shape: f32[8,128], index: 3, kind: output, shape index: {}]  }
   0x1   :  { %v205_v0 = vld [vmem:[%s301_s1 + $0x38] sm:$0xff]   ;;  %182 = vmatprep.subr.bf16.mxu0 %v235_v1  ;;  %v206_v3 = vld [vmem:[%s301_s1 + $0x30] sm:$0xff]   ;;  %198 = vmatprep.mubr.msk.bf16.mxu0 %vm236_vm1, %v235_v1 }
   0x2   :  { %v106_v2 = vsel %vm80_vm0, %v205_v0, 0  ;;  %v103_v4 = vsel %vm80_vm0, %v206_v3, 0 }
   0x3   :  { %183 = vmatpush3.bf16.xpose.msra.mxu0 %v106_v2 }
   0x4   :  { %184 = vmatprep.subr.bf16.mxu0 %v235_v1 }
   0x5   :  { %8 = vsyncpa [#allocation3], 0  ;;  %v207_v5 = vld [vmem:[%s301_s1 + $0x28] sm:$0xff]   ;;  %v208_v7 = vld [vmem:[%s301_s1 + $0x20] sm:$0xff]   ;;  %s237_s5 = smov [#allocation2]  }
   0x6   :  { %v100_v6 = vsel %vm80_vm0, %v207_v5, 0  ;;  %v97_v8 = vsel %vm80_vm0, %v208_v7, 0  ;;  %v209_v9 = vld [vmem:[%s301_s1 + $0x18] sm:$0xff]   ;;  %v210_v11 = vld [vmem:[%s301_s1 + $0x10] sm:$0xff]   ;;  %v211_v13 = vld [vmem:[%s301_s1 + $0x8] sm:$0xff]   ;;  %s155_s6 = sshll.u32 %s237_s5, 4  ;;  %s156_s6 = int_to_ptr.vmem [resolvable:$true] %s155_s6 }
   0x7   :  { %v94_v10 = vsel %vm80_vm0, %v209_v9, 0  ;;  %v91_v12 = vsel %vm80_vm0, %v210_v11, 0  ;;  %v88_v14 = vsel %vm80_vm0, %v211_v13, 0  ;;  %v212_v15 = vld [vmem:[%s301_s1] sm:$0xff]   ;;  %s213_s1 = scalar_lea.vmem %s156_s6, 128  ;;  %p218_p1 = scmp.lt.s32.totalorder %s156_s6, %s156_s6 }
   0x8   :  { %v85_v16 = vsel %vm80_vm0, %v212_v15, 0  ;;  %v16_v17 = vld [vmem:[%s300_s0] sm:$0xf]  ;;  %p214_p0 = scmp.ne.s32.totalorder %s156_s6, %s213_s1  ;;  %p219_p2 = scmp.lt.s32.totalorder %s213_s1, %s213_s1 }
   0x9   :  { %v163_v18 = vld [vmem:[%s302_s2] ss:$0 sm:$0xff] }
   0xa   :  { %p220_p3 = por %p219_p2, %p218_p1 }
   0xb   :  { %185 = vmatpush3.bf16.xpose.msra.mxu0 %v103_v4 }
   0xc   :  { %186 = vmatprep.subr.bf16.mxu0 %v235_v1  ;;  %p221_p4 = pnand %p220_p3, %p214_p0 }
  0x13   :  { %187 = vmatpush3.bf16.xpose.msra.mxu0 %v100_v6 }
  0x14   :  { %188 = vmatprep.subr.bf16.mxu0 %v235_v1 }
  0x1b   :  { %189 = vmatpush3.bf16.xpose.msra.mxu0 %v97_v8 }
  0x1c   :  { %190 = vmatprep.subr.bf16.mxu0 %v235_v1 }
  0x23   :  { %191 = vmatpush3.bf16.xpose.msra.mxu0 %v94_v10 }
  0x24   :  { %192 = vmatprep.subr.bf16.mxu0 %v235_v1 }
  0x2b   :  { %193 = vmatpush3.bf16.xpose.msra.mxu0 %v91_v12 }
  0x2c   :  { %194 = vmatprep.subr.bf16.mxu0 %v235_v1 }
  0x33   :  { %195 = vmatpush3.bf16.xpose.msra.mxu0 %v88_v14 }
  0x34   :  { %196 = vmatprep.subr.bf16.mxu0 %v235_v1 }
  0x3b   :  { %197 = vmatpush3.bf16.xpose.msra.mxu0 %v85_v16 }
  0x42   :  { %199 = vmatmul.mubr.msk.bf16.vlgmr.msra.gmra.mxu0 %vm80_vm0, %v16_v17 }
 0x102   :  { %v142_v19 = vpop.f32.mrf.mxu0 }
 0x103   :  { %v143_v20 = vadd.f32 %v163_v18, %v142_v19 }
 0x104   :  { %v200_v21 = vpop.f32.mrf.mxu0 }
 0x105   :  { %148 = vst [vmem:[#allocation2] sm:$0xff] %v143_v20 }
 0x106   :  { %v145_v22 = vpop.f32.mrf.mxu0 }
 0x107   :  { %224 = shalt.err (!%p221_p4)
}
 0x108   :  { %158 = dma.vmem_to_hbm [thread:$0]  %s156_s6, 128, %s303_s3, [#allocation3]   ;;  %v201_v23 = vpop.f32.mrf.mxu0 }
 0x109   :  { %233 = dma.done.wait [#allocation3], 128  }
 0x10a   :  { %234 = vsyncadd [#allocation3], 4294967168 }
 0x10b   :  { %162 = vsyncpa [#allocation3], 1 }

</bundles_post_ra>
